<compile_context>
chip_gen: v7x
topology: tpu7x:2x2x1
jax: 0.10.0
libtpu: 0.0.40
codegen_flags: <defaults>
</compile_context>

<pallas_src>
import functools

import jax
import jax.numpy as jnp
from jax import lax
from jax.experimental import pallas as pl
from jax.experimental.pallas import tpu as pltpu

GAMMA = 32.0
MARGIN = 0.25
NEG_INF = -99999999.0

# Static logsumexp bounds (dist in [-1, 1] because both sides are L2-normalized).
M_P = GAMMA                   # max of logit_p = -GAMMA*dist
M_N = GAMMA * (1.0 + MARGIN)  # max of logit_n =  GAMMA*(dist + MARGIN)


def _cosface_kernel(feat_ref, queue_ref, tgt_ref, qlabel_ref, out_ref,
                    feat_bf, s_p, s_n):
    n = pl.program_id(0)
    k = pl.program_id(1)
    nk = pl.num_programs(1)

    @pl.when(k == 0)
    def _init():
        # Hoisted bf16 cast of the resident feat block (reused for every K tile).
        feat_bf[...] = feat_ref[...].astype(jnp.bfloat16)
        s_p[...] = jnp.zeros_like(s_p)
        s_n[...] = jnp.zeros_like(s_n)

    q = queue_ref[...]
    if q.dtype != jnp.bfloat16:            # trace-time check; no-op for bf16 queue
        q = q.astype(jnp.bfloat16)

    # Similarity tile on the MXU: bf16 inputs, f32 accumulation.
    dist = jnp.dot(feat_bf[...], q, preferred_element_type=jnp.float32)  # (TN, TK)
    tn, tk = dist.shape

    label_eq = tgt_ref[...] == qlabel_ref[...]                            # (TN, TK)

    # torch subtracts eye(N, N) (zero-padded to (N, K)) from is_pos: global
    # column i is never a positive for row i, regardless of queue_ptr
    # (faithful to the torch code — columns 0..N-1, not the ptr-shifted slots).
    rows = lax.broadcasted_iota(jnp.int32, (tn, tk), 0)
    cols = lax.broadcasted_iota(jnp.int32, (tn, tk), 1)
    not_diag = (rows - cols) != (k * tk - n * tn)

    g = GAMMA * dist
    # Static-bound LSE terms; exp args are bounded (≤0 up to bf16 rounding) so
    # no overflow, and underflow stays well inside f32 range (≥ ~exp(-64)).
    e_p = jnp.where(jnp.logical_and(label_eq, not_diag), jnp.exp(-g - M_P), 0.0)
    e_n = jnp.where(label_eq, 0.0, jnp.exp(g + GAMMA * MARGIN - M_N))

    # Lane-partial accumulation: plain VPU adds per 128-lane group; the single
    # cross-lane (XLU) reduction is deferred to the finalize step.
    acc_p = s_p[...]
    acc_n = s_n[...]
    for qg in range(tk // 128):
        sl = slice(qg * 128, (qg + 1) * 128)
        acc_p = acc_p + e_p[:, sl]
        acc_n = acc_n + e_n[:, sl]
    s_p[...] = acc_p
    s_n[...] = acc_n

    @pl.when(k == nk - 1)
    def _finalize():
        sum_p = jnp.sum(s_p[...], axis=1, keepdims=True)   # (TN, 1)
        sum_n = jnp.sum(s_n[...], axis=1, keepdims=True)
        # A row with zero positives (or zero negatives) gives log(0) = -inf,
        # z = -inf, softplus(z) = 0 — matching the reference (NEG_INF logits).
        z = (M_P + jnp.log(sum_p)) + (M_N + jnp.log(sum_n))
        # torch.nn.functional.softplus (beta=1, threshold=20)
        out_ref[...] = jnp.where(z > 20.0, z,
                                 jnp.log1p(jnp.exp(jnp.minimum(z, 20.0))))


def _vmem_budget_bytes():
    cap = 64 << 20  # conservative: v7x physical VMEM per TensorCore
    try:
        info = pltpu.get_tpu_info()
        cap = int(getattr(info, "vmem_capacity_bytes", cap))
    except Exception:
        pass
    return int(min(cap * 0.7, 100 << 20))


def _working_set_bytes(D, TN, TK, qbytes):
    pipelined = 2 * (D * TK * qbytes + TK * 4)          # queue + label tiles, 2-deep
    temps = 8 * TN * TK * 4                             # live (TN,TK) temporaries
    resident = TN * D * 4 + TN * D * 2 + 2 * TN * 128 * 4 + 8 * TN
    return pipelined + temps + resident + (4 << 20)


def _pick_tile_n(N):
    if N <= 8:
        return N
    # Prefer ≥2 row tiles so the "parallel" grid axis can use both TensorCores
    # (v7x), while keeping tiles large enough to amortize queue re-streaming.
    for cand in (256, 128, 64, 32, 16, 8):
        if N % cand == 0 and N // cand >= 2:
            return cand
    return N


def _pick_tile_k(K, D, TN, qbytes):
    # Lane-dense, 256-multiple K tiles amortize per-grid-step overhead and keep
    # the queue DMA near the HBM roofline; bounded by the per-generation VMEM.
    budget = _vmem_budget_bytes()
    for cand in (4096, 2048, 1024, 512, 256, 128):
        if cand <= K and K % cand == 0 and _working_set_bytes(D, TN, cand, qbytes) <= budget:
            return cand
    return 128


@functools.partial(jax.jit, static_argnames=("tile_k",), donate_argnums=(2, 3, 4))
def memory_forward(feat_q, targets, queue, queue_label, queue_ptr, *, tile_k=None):
    """Reproduces Memory.forward: returns (loss, new_queue, new_queue_label, new_ptr).

    queue / queue_label / queue_ptr are donated so the enqueue is an in-place
    N-column update instead of a full (D, K) HBM copy.
    """
    # TODO(synk): distributed path (comm.get_world_size() > 1 + concat_all_gather)
    # is not implemented; single-device enqueue only.
    N, D = feat_q.shape
    Dq, K = queue.shape
    assert Dq == D and K % N == 0 and K % 128 == 0

    # feat_q = F.normalize(feat_q, p=2, dim=1)  (tiny (N, D) op, fused by jit).
    norm = jnp.sqrt(jnp.sum(feat_q * feat_q, axis=1, keepdims=True))
    feat_qn = feat_q / jnp.maximum(norm, 1e-12)

    # _dequeue_and_enqueue (in place thanks to buffer donation).
    ptr = queue_ptr[0]
    new_queue = lax.dynamic_update_slice(
        queue, feat_qn.T.astype(queue.dtype), (jnp.int32(0), ptr))
    new_queue_label = lax.dynamic_update_slice(
        queue_label, targets.reshape(1, N).astype(queue_label.dtype),
        (jnp.int32(0), ptr))
    new_ptr = jnp.mod(ptr + N, K).reshape(1).astype(queue_ptr.dtype)

    # _pairwise_cosface hot path in Pallas (against the *updated* queue).
    qbytes = jnp.dtype(new_queue.dtype).itemsize
    TN = _pick_tile_n(N)
    TK = tile_k if tile_k is not None else _pick_tile_k(K, D, TN, qbytes)
    assert N % TN == 0 and K % TK == 0 and TK % 128 == 0

    row_softplus = pl.pallas_call(
        _cosface_kernel,
        out_shape=jax.ShapeDtypeStruct((N, 1), jnp.float32),
        grid_spec=pltpu.PrefetchScalarGridSpec(
            num_scalar_prefetch=0,
            grid=(N // TN, K // TK),
            in_specs=[
                pl.BlockSpec((TN, D), lambda n, k: (n, 0)),   # feat_qn (f32)
                pl.BlockSpec((D, TK), lambda n, k: (0, k)),   # queue (bf16)
                pl.BlockSpec((TN, 1), lambda n, k: (n, 0)),   # targets
                pl.BlockSpec((1, TK), lambda n, k: (0, k)),   # queue_label
            ],
            out_specs=pl.BlockSpec((TN, 1), lambda n, k: (n, 0)),
            scratch_shapes=[
                pltpu.VMEM((TN, D), jnp.bfloat16),    # hoisted bf16 feat
                pltpu.VMEM((TN, 128), jnp.float32),   # lane-partial s_p
                pltpu.VMEM((TN, 128), jnp.float32),   # lane-partial s_n
            ],
        ),
        compiler_params=pltpu.CompilerParams(
            dimension_semantics=("parallel", "arbitrary"),
            vmem_limit_bytes=_vmem_budget_bytes(),
        ),
    )(feat_qn, new_queue,
      targets.reshape(N, 1).astype(jnp.int32),
      new_queue_label.astype(jnp.int32))

    loss = jnp.mean(row_softplus)
    return loss, new_queue, new_queue_label, new_ptr


def _reference_loss(feat_q, targets, queue, queue_label, queue_ptr):
    """Pure-JAX transcription of the torch module (bf16 matmul to match the
    kernel's MXU input precision)."""
    N, D = feat_q.shape
    K = queue.shape[1]
    feat_qn = feat_q / jnp.maximum(
        jnp.sqrt(jnp.sum(feat_q * feat_q, axis=1, keepdims=True)), 1e-12)
    ptr = int(queue_ptr[0])
    q = queue.at[:, ptr:ptr + N].set(feat_qn.T.astype(queue.dtype))
    ql = queue_label.at[:, ptr:ptr + N].set(targets.reshape(1, N).astype(queue_label.dtype))
    dist = jnp.dot(feat_qn.astype(jnp.bfloat16), q.astype(jnp.bfloat16),
                   preferred_element_type=jnp.float32)
    is_pos = (targets.reshape(N, 1) == ql).astype(jnp.float32)
    is_neg = (targets.reshape(N, 1) != ql).astype(jnp.float32)
    same_indx = jnp.concatenate(
        [jnp.eye(N, dtype=jnp.float32), jnp.zeros((N, K - N), jnp.float32)], axis=1)
    is_pos = is_pos - same_indx
    logit_p = -GAMMA * (dist * is_pos) + NEG_INF * (1.0 - is_pos)
    logit_n = GAMMA * (dist * is_neg + MARGIN) + NEG_INF * (1.0 - is_neg)

    def lse(x):
        m = jnp.max(x, axis=1, keepdims=True)
        return m + jnp.log(jnp.sum(jnp.exp(x - m), axis=1, keepdims=True))

    z = (lse(logit_p) + lse(logit_n))[:, 0]
    sp = jnp.where(z > 20.0, z, jnp.log1p(jnp.exp(jnp.minimum(z, 20.0))))
    return jnp.mean(sp)


if __name__ == "__main__":
    # Small MoCo-consistent shapes: dim=32, queue K=1024, batch N=8.
    dim, K, N = 32, 1024, 8
    key = jax.random.PRNGKey(0)
    k1, k2, k3 = jax.random.split(key, 3)

    # Buffers as in __init__: queue = normalize(randn(dim, K), dim=0), stored bf16.
    queue_f32 = jax.random.normal(k1, (dim, K), dtype=jnp.float32)
    queue_f32 = queue_f32 / jnp.maximum(
        jnp.linalg.norm(queue_f32, axis=0, keepdims=True), 1e-12)
    queue = queue_f32.astype(jnp.bfloat16)
    queue_label = jnp.zeros((1, K), dtype=jnp.int32)   # torch.long -> int32 (x64 off)
    queue_ptr = jnp.zeros((1,), dtype=jnp.int32)

    feat_q = jax.random.normal(k2, (N, dim), dtype=jnp.float32)
    targets = jax.random.randint(k3, (N,), 0, 4, dtype=jnp.int32)

    # Reference before the jitted call (queue buffers are donated to the jit).
    loss_ref = float(_reference_loss(feat_q, targets, queue, queue_label, queue_ptr))

    # 1) Forced tile_k=256 -> 4 K tiles: exercises init/accumulate/finalize path.
    loss, new_queue, new_queue_label, new_ptr = memory_forward(
        feat_q, targets, queue, queue_label, queue_ptr, tile_k=256)
    jax.block_until_ready((loss, new_queue, new_queue_label, new_ptr))
    loss_val = float(loss)
    assert jnp.isfinite(loss_val), "loss is not finite"
    assert abs(loss_val - loss_ref) <= 1e-2 + 1e-2 * abs(loss_ref), (
        f"loss mismatch (tiled): kernel={loss_val} reference={loss_ref}")
    assert int(new_ptr[0]) == N % K

    # 2) Auto tile path (exercises _pick_tile_k / VMEM budgeting) with fresh
    #    buffers (the previous ones were donated).
    queue2 = queue_f32.astype(jnp.bfloat16)
    queue_label2 = jnp.zeros((1, K), dtype=jnp.int32)
    queue_ptr2 = jnp.zeros((1,), dtype=jnp.int32)
    loss2, _, _, _ = memory_forward(feat_q, targets, queue2, queue_label2, queue_ptr2)
    jax.block_until_ready(loss2)
    loss2_val = float(loss2)
    assert abs(loss2_val - loss_ref) <= 1e-2 + 1e-2 * abs(loss_ref), (
        f"loss mismatch (auto): kernel={loss2_val} reference={loss_ref}")

    print("KERNEL_OK")
</pallas_src>

<mosaic_0001>
module attributes {stable_mosaic.version = 11 : i64} {
  func.func @_cosface_kernel(%arg0: i32, %arg1: i32, %arg2: memref<8x32xf32, #tpu.memory_space<vmem>>, %arg3: memref<32x256xbf16, #tpu.memory_space<vmem>>, %arg4: memref<8x1xi32, #tpu.memory_space<vmem>>, %arg5: memref<1x256xi32, #tpu.memory_space<vmem>>, %arg6: memref<8x1xf32, #tpu.memory_space<vmem>>, %arg7: memref<8x32xbf16, #tpu.memory_space<vmem>>, %arg8: memref<8x128xf32, #tpu.memory_space<vmem>>, %arg9: memref<8x128xf32, #tpu.memory_space<vmem>>) attributes {dimension_semantics = [#tpu.dimension_semantics<parallel>, #tpu.dimension_semantics<arbitrary>], iteration_bounds = array<i64: 1, 4>, scalar_prefetch = 0 : i64, scratch_operands = 3 : i64, tpu.core_type = #tpu.core_type<tc>, window_params = [{transform_indices = @transform_0, window_bounds = array<i64: 8, 32>}, {transform_indices = @transform_1, window_bounds = array<i64: 32, 256>}, {transform_indices = @transform_2, window_bounds = array<i64: 8, 1>}, {transform_indices = @transform_3, window_bounds = array<i64: 1, 256>}, {transform_indices = @transform_4, window_bounds = array<i64: 8, 1>}]} {
    %c0_i32 = arith.constant 0 : i32
    %0 = arith.cmpi eq, %arg1, %c0_i32 : i32
    %1 = arith.extui %0 : i1 to i32
    %c0_i32_0 = arith.constant 0 : i32
    %2 = arith.cmpi ne, %1, %c0_i32_0 : i32
    scf.if %2 {
      %c0_24 = arith.constant 0 : index
      %c0_25 = arith.constant 0 : index
      %51 = vector.load %arg2[%c0_24, %c0_25] : memref<8x32xf32, #tpu.memory_space<vmem>>, vector<8x32xf32>
      %52 = arith.truncf %51 : vector<8x32xf32> to vector<8x32xbf16>
      %c0_26 = arith.constant 0 : index
      %c0_27 = arith.constant 0 : index
      %53 = vector.load %arg7[%c0_26, %c0_27] : memref<8x32xbf16, #tpu.memory_space<vmem>>, vector<8x32xbf16>
      tpu.vector_store %arg7[%c0_26, %c0_27], %52 {strides = array<i32>} : memref<8x32xbf16, #tpu.memory_space<vmem>>, vector<8x32xbf16>,
      %cst_28 = arith.constant 0.000000e+00 : f32
      %54 = vector.broadcast %cst_28 : f32 to vector<8x128xf32>
      %c0_29 = arith.constant 0 : index
      %c0_30 = arith.constant 0 : index
      %55 = vector.load %arg8[%c0_29, %c0_30] : memref<8x128xf32, #tpu.memory_space<vmem>>, vector<8x128xf32>
      tpu.vector_store %arg8[%c0_29, %c0_30], %54 {strides = array<i32>} : memref<8x128xf32, #tpu.memory_space<vmem>>, vector<8x128xf32>,
      %cst_31 = arith.constant 0.000000e+00 : f32
      %56 = vector.broadcast %cst_31 : f32 to vector<8x128xf32>
      %c0_32 = arith.constant 0 : index
      %c0_33 = arith.constant 0 : index
      %57 = vector.load %arg9[%c0_32, %c0_33] : memref<8x128xf32, #tpu.memory_space<vmem>>, vector<8x128xf32>
      tpu.vector_store %arg9[%c0_32, %c0_33], %56 {strides = array<i32>} : memref<8x128xf32, #tpu.memory_space<vmem>>, vector<8x128xf32>,
    } else {
    }
    %c0 = arith.constant 0 : index
    %c0_1 = arith.constant 0 : index
    %3 = vector.load %arg3[%c0, %c0_1] : memref<32x256xbf16, #tpu.memory_space<vmem>>, vector<32x256xbf16>
    %c0_2 = arith.constant 0 : index
    %c0_3 = arith.constant 0 : index
    %4 = vector.load %arg7[%c0_2, %c0_3] : memref<8x32xbf16, #tpu.memory_space<vmem>>, vector<8x32xbf16>
    %cst = arith.constant dense<0.000000e+00> : vector<8x256xf32>
    %5 = tpu.matmul %4, %3, %cst {dimension_numbers = #tpu.dot_dimension_numbers<[1], [0], [0], [1], [0, 0, 1, 1], [], []>} : vector<8x32xbf16>, vector<32x256xbf16>, vector<8x256xf32> -> vector<8x256xf32>
    %c0_4 = arith.constant 0 : index
    %c0_5 = arith.constant 0 : index
    %6 = vector.load %arg4[%c0_4, %c0_5] : memref<8x1xi32, #tpu.memory_space<vmem>>, vector<8x1xi32>
    %c0_6 = arith.constant 0 : index
    %c0_7 = arith.constant 0 : index
    %7 = vector.load %arg5[%c0_6, %c0_7] : memref<1x256xi32, #tpu.memory_space<vmem>>, vector<1x256xi32>
    %8 = vector.broadcast %6 : vector<8x1xi32> to vector<8x256xi32>
    %9 = vector.broadcast %7 : vector<1x256xi32> to vector<8x256xi32>
    %10 = arith.cmpi eq, %8, %9 : vector<8x256xi32>
    %11 = tpu.iota {dimensions = array<i32: 0>} : vector<8x256xi32>
    %12 = tpu.iota {dimensions = array<i32: 1>} : vector<8x256xi32>
    %13 = arith.subi %11, %12 : vector<8x256xi32>
    %c256_i32 = arith.constant 256 : i32
    %14 = arith.muli %arg1, %c256_i32 : i32
    %c8_i32 = arith.constant 8 : i32
    %15 = arith.muli %arg0, %c8_i32 : i32
    %16 = arith.subi %14, %15 : i32
    %17 = vector.broadcast %16 : i32 to vector<8x256xi32>
    %18 = arith.cmpi ne, %13, %17 : vector<8x256xi32>
    %cst_8 = arith.constant 3.200000e+01 : f32
    %19 = vector.broadcast %cst_8 : f32 to vector<8x256xf32>
    %20 = arith.mulf %19, %5 : vector<8x256xf32>
    %21 = arith.andi %10, %18 : vector<8x256xi1>
    %cst_9 = arith.constant 0.000000e+00 : f32
    %22 = vector.broadcast %cst_9 : f32 to vector<8x256xf32>
    %23 = arith.subf %22, %20 : vector<8x256xf32>
    %cst_10 = arith.constant 3.200000e+01 : f32
    %24 = vector.broadcast %cst_10 : f32 to vector<8x256xf32>
    %25 = arith.subf %23, %24 : vector<8x256xf32>
    %26 = math.exp %25 : vector<8x256xf32>
    %cst_11 = arith.constant 0.000000e+00 : f32
    %27 = vector.broadcast %cst_11 : f32 to vector<8x256xf32>
    %28 = arith.select %21, %26, %27 : vector<8x256xi1>, vector<8x256xf32>
    %cst_12 = arith.constant 8.000000e+00 : f32
    %29 = vector.broadcast %cst_12 : f32 to vector<8x256xf32>
    %30 = arith.addf %20, %29 : vector<8x256xf32>
    %cst_13 = arith.constant 4.000000e+01 : f32
    %31 = vector.broadcast %cst_13 : f32 to vector<8x256xf32>
    %32 = arith.subf %30, %31 : vector<8x256xf32>
    %33 = math.exp %32 : vector<8x256xf32>
    %cst_14 = arith.constant 0.000000e+00 : f32
    %34 = vector.broadcast %cst_14 : f32 to vector<8x256xf32>
    %35 = arith.select %10, %34, %33 : vector<8x256xi1>, vector<8x256xf32>
    %c0_15 = arith.constant 0 : index
    %c0_16 = arith.constant 0 : index
    %36 = vector.load %arg8[%c0_15, %c0_16] : memref<8x128xf32, #tpu.memory_space<vmem>>, vector<8x128xf32>
    %c0_17 = arith.constant 0 : index
    %c0_18 = arith.constant 0 : index
    %37 = vector.load %arg9[%c0_17, %c0_18] : memref<8x128xf32, #tpu.memory_space<vmem>>, vector<8x128xf32>
    %38 = vector.extract_strided_slice %28 {offsets = [0, 0], sizes = [8, 128], strides = [1, 1]} : vector<8x256xf32> to vector<8x128xf32>
    %39 = arith.addf %36, %38 : vector<8x128xf32>
    %40 = vector.extract_strided_slice %35 {offsets = [0, 0], sizes = [8, 128], strides = [1, 1]} : vector<8x256xf32> to vector<8x128xf32>
    %41 = arith.addf %37, %40 : vector<8x128xf32>
    %42 = vector.extract_strided_slice %28 {offsets = [0, 128], sizes = [8, 128], strides = [1, 1]} : vector<8x256xf32> to vector<8x128xf32>
    %43 = arith.addf %39, %42 : vector<8x128xf32>
    %44 = vector.extract_strided_slice %35 {offsets = [0, 128], sizes = [8, 128], strides = [1, 1]} : vector<8x256xf32> to vector<8x128xf32>
    %45 = arith.addf %41, %44 : vector<8x128xf32>
    %c0_19 = arith.constant 0 : index
    %c0_20 = arith.constant 0 : index
    %46 = vector.load %arg8[%c0_19, %c0_20] : memref<8x128xf32, #tpu.memory_space<vmem>>, vector<8x128xf32>
    tpu.vector_store %arg8[%c0_19, %c0_20], %43 {strides = array<i32>} : memref<8x128xf32, #tpu.memory_space<vmem>>, vector<8x128xf32>,
    %c0_21 = arith.constant 0 : index
    %c0_22 = arith.constant 0 : index
    %47 = vector.load %arg9[%c0_21, %c0_22] : memref<8x128xf32, #tpu.memory_space<vmem>>, vector<8x128xf32>
    tpu.vector_store %arg9[%c0_21, %c0_22], %45 {strides = array<i32>} : memref<8x128xf32, #tpu.memory_space<vmem>>, vector<8x128xf32>,
    %c3_i32 = arith.constant 3 : i32
    %48 = arith.cmpi eq, %arg1, %c3_i32 : i32
    %49 = arith.extui %48 : i1 to i32
    %c0_i32_23 = arith.constant 0 : i32
    %50 = arith.cmpi ne, %49, %c0_i32_23 : i32
    scf.if %50 {
      %c0_24 = arith.constant 0 : index
      %c0_25 = arith.constant 0 : index
      %51 = vector.load %arg8[%c0_24, %c0_25] : memref<8x128xf32, #tpu.memory_space<vmem>>, vector<8x128xf32>
      %cst_26 = arith.constant dense<0.000000e+00> : vector<8xf32>
      %52 = vector.multi_reduction <add>, %51, %cst_26 [1] : vector<8x128xf32> to vector<8xf32>
      %53 = vector.shape_cast %52 : vector<8xf32> to vector<8x1xf32>
      %c0_27 = arith.constant 0 : index
      %c0_28 = arith.constant 0 : index
      %54 = vector.load %arg9[%c0_27, %c0_28] : memref<8x128xf32, #tpu.memory_space<vmem>>, vector<8x128xf32>
      %cst_29 = arith.constant dense<0.000000e+00> : vector<8xf32>
      %55 = vector.multi_reduction <add>, %54, %cst_29 [1] : vector<8x128xf32> to vector<8xf32>
      %56 = vector.shape_cast %55 : vector<8xf32> to vector<8x1xf32>
      %57 = math.log %53 : vector<8x1xf32>
      %cst_30 = arith.constant 3.200000e+01 : f32
      %58 = vector.broadcast %cst_30 : f32 to vector<8x1xf32>
      %59 = arith.addf %58, %57 : vector<8x1xf32>
      %60 = math.log %56 : vector<8x1xf32>
      %cst_31 = arith.constant 4.000000e+01 : f32
      %61 = vector.broadcast %cst_31 : f32 to vector<8x1xf32>
      %62 = arith.addf %61, %60 : vector<8x1xf32>
      %63 = arith.addf %59, %62 : vector<8x1xf32>
      %cst_32 = arith.constant 2.000000e+01 : f32
      %64 = vector.broadcast %cst_32 : f32 to vector<8x1xf32>
      %65 = arith.cmpf ogt, %63, %64 : vector<8x1xf32>
      %cst_33 = arith.constant 2.000000e+01 : f32
      %66 = vector.broadcast %cst_33 : f32 to vector<8x1xf32>
      %67 = arith.minimumf %63, %66 : vector<8x1xf32>
      %68 = math.exp %67 : vector<8x1xf32>
      %69 = math.log1p %68 : vector<8x1xf32>
      %70 = arith.select %65, %63, %69 : vector<8x1xi1>, vector<8x1xf32>
      %c0_34 = arith.constant 0 : index
      %c0_35 = arith.constant 0 : index
      %71 = vector.load %arg6[%c0_34, %c0_35] : memref<8x1xf32, #tpu.memory_space<vmem>>, vector<8x1xf32>
      tpu.vector_store %arg6[%c0_34, %c0_35], %70 {strides = array<i32>} : memref<8x1xf32, #tpu.memory_space<vmem>>, vector<8x1xf32>,
    } else {
    }
    return
  }
  func.func @transform_0(%arg0: i32, %arg1: i32) -> (i32, i32) {
    %c0_i32 = arith.constant 0 : i32
    %c0_i32_0 = arith.constant 0 : i32
    return %arg0, %c0_i32 : i32, i32
  }
  func.func @transform_1(%arg0: i32, %arg1: i32) -> (i32, i32) {
    %c0_i32 = arith.constant 0 : i32
    %c0_i32_0 = arith.constant 0 : i32
    return %c0_i32, %arg1 : i32, i32
  }
  func.func @transform_2(%arg0: i32, %arg1: i32) -> (i32, i32) {
    %c0_i32 = arith.constant 0 : i32
    %c0_i32_0 = arith.constant 0 : i32
    return %arg0, %c0_i32 : i32, i32
  }
  func.func @transform_3(%arg0: i32, %arg1: i32) -> (i32, i32) {
    %c0_i32 = arith.constant 0 : i32
    %c0_i32_0 = arith.constant 0 : i32
    return %c0_i32, %arg1 : i32, i32
  }
  func.func @transform_4(%arg0: i32, %arg1: i32) -> (i32, i32) {
    %c0_i32 = arith.constant 0 : i32
    %c0_i32_0 = arith.constant 0 : i32
    return %arg0, %c0_i32 : i32, i32
  }
}

</mosaic_0001>

<bundles_post_ra>
// kernel: memory_forward.1
= control target key start
LH: loop header
LB: loop body
LE: loop exit
PB: predicated region body
PF: predicated region fallthrough
CT: control target
= control target key end

     0   :  { %s746_s15 = smov 0   ;;  %s748_s16 = smov 0   ;;  %s831_s0 = inlined_call_operand.vmem [shape: f32[8,32], index: 0, kind: input, shape index: {}]   ;;  %s832_s1 = inlined_call_operand.vmem [shape: bf16[32,1024], index: 1, kind: input, shape index: {}]   ;;  %s833_s2 = inlined_call_operand.vmem [shape: s32[8,1], index: 2, kind: input, shape index: {}]   ;;  %s834_s3 = inlined_call_operand.vmem [shape: s32[1,1024], index: 3, kind: input, shape index: {}]   ;;  %s835_s4 = inlined_call_operand.vmem [shape: f32[8,1], index: 4, kind: output, shape index: {}]  }
   0x1   :  { %s750_s17 = smov 0   ;;  %s752_s18 = smov 0  }
   0x2   :  { %s754_s19 = smov 0  }
   0x3 LB: > { %s23_s20 = sadd.s32 1, %s713_s18  ;;  %p66_p1 = scmp.ne.s32.totalorder %s705_s16, %s701_s15  ;;  %s717_s19 = sphi %s754_s19, %s14_s19   ;;  %s713_s18 = sphi %s752_s18, %s839_s18   ;;  %s709_s17 = sphi %s750_s17, %s838_s17   ;;  %s705_s16 = sphi %s748_s16, %s837_s16   ;;  %s701_s15 = sphi %s746_s15, %s836_s15  }
   0x4   : > { %p24_p0 = scmp.ge.s32.totalorder %s23_s20, 4  ;;  %p67_p2 = scmp.eq.s32.totalorder %s717_s19, 0 }
   0x5   : > { %s59_s22 = sadd.s32 1, %s705_s16  ;;  %p591_p5 = scmp.ge.s32.totalorder %s717_s19, 4 }
   0x6   : > { %s841_s20 = smov (%p24_p0, %s23_s20), 0  ;;  %p68_p3 = por %p67_p2, %p66_p1 }
   0x7   : > { %s56_s21 = ssub.s32 %s713_s18, %s841_s20  ;;  %184 = sbr.rel (%p591_p5) target bundleno = 22 (0x16), region = 24 }
   0x8   : > { %p57_p4 = scmp.eq.s32.totalorder %s56_s21, 0 }
   0xa   : > { %s781_s23 = scalar_select %p57_p4, %s705_s16, %s59_s22  }
   0xe   : > { %187 = sbr.rel (!%p68_p3) target bundleno = 22 (0x16), region = 28  ;;  %s189_s24 = sand.u32 (%p68_p3), 1, %s705_s16  }
   0xf   : > { %s613_s25 = sshll.u32 (%p68_p3), %s713_s18, 3  ;;  %s592_s26 = sshll.u32 (%p68_p3), %s189_s24, 5 }
  0x10   : > { %s194_s29 = scalar_lea.vmem (%p68_p3), %s832_s1, %s613_s25  ;;  %s191_s30 = scalar_lea.vmem (%p68_p3), [#allocation5], %s592_s26 }
  0x11   : > { %v228_v0 = vld [vmem:[%s194_s29] sm:$0xff] (%p68_p3) }
  0x12   : > { %v230_v1 = vld [vmem:[%s194_s29 + $0x20] sm:$0xff] (%p68_p3)  ;;  %229 = vst [vmem:[%s191_s30] sm:$0xff] (%p68_p3), %v228_v0 }
  0x13   : > { %v232_v2 = vld [vmem:[%s194_s29 + $0x40] sm:$0xff] (%p68_p3)  ;;  %231 = vst [vmem:[%s191_s30 + $0x8] sm:$0xff] (%p68_p3), %v230_v1 }
  0x14   : > { %233 = vst [vmem:[%s191_s30 + $0x10] sm:$0xff] (%p68_p3), %v232_v2  ;;  %v234_v3 = vld [vmem:[%s194_s29 + $0x60] sm:$0xff] (%p68_p3) }
  0x15   : > { %235 = vst [vmem:[%s191_s30 + $0x18] sm:$0xff] %v234_v3 }
  0x16 PF: > { %p595_p6 = scmp.ge.s32.totalorder %s717_s19, 1  ;;  %p248_p7 = scmp.lt.s32.totalorder %s717_s19, 5 }
  0x18   : > { %p249_p8 = pnand %p595_p6, %p248_p7 }
  0x19   : > { %s255_s5 = sand.u32 (!%p249_p8), 1, %s701_s15   ;;  %s597_s6 = sshll.u32 (!%p249_p8), %s709_s17, 1 }
  0x1a   : > { %252 = sbr.rel (%p249_p8) target bundleno = 490 (0x1ea), region = 70  ;;  %s596_s7 = sshll.u32 (!%p249_p8), %s255_s5, 5 }
  0x1b   : > { %p301_p9 = scmp.lt.s32.totalorder (!%p249_p8), %s597_s6, 7  ;;  %s257_s11 = scalar_lea.vmem (!%p249_p8), [#allocation5], %s596_s7 }
  0x1c   : > { %p598_p10 = scmp.ne.s32.totalorder (!%p249_p8), %s709_s17, 0 }
  0x21   : > { %s843_s6 = smov (!%p301_p9, %s597_s6), 7  ;;  %313 = sbr.rel (%p598_p10) target bundleno = 40 (0x28), region = 78 }
  0x22   : > { %s303_s10 = scalar_lea.vmem %s834_s3, %s843_s6  ;;  %v314_v4 = vld [vmem:[%s831_s0] sm:$0xff] (!%p598_p10)  ;;  %vm316_vm0 = vcmask (!%p598_p10), 257024   ;;  %v719_v6 = vmov (!%p598_p10), 0.0  }
  0x23   : > { %v315_v5 = vpack.c.bf16 (!%p598_p10), %v314_v4, %v314_v4  ;;  %318 = vst [vmem:[#allocation3] sm:$0xff] (!%p598_p10), %v719_v6  ;;  %319 = vst [vmem:[#allocation4] sm:$0xff] (!%p598_p10), %v719_v6 }
  0x25   : > { %317 = vst.msk [vmem:[#allocation2] sm:$0xf] (!%p598_p10), %vm316_vm0, %v315_v5 }
  0x28 PF: > { %v657_v7 = vld [vmem:[%s257_s11 + $0x4] ss:$8 sps:$4 sm:$0xff]   ;;  %v659_v8 = vld [vmem:[%s257_s11] ss:$8 sps:$4 sm:$0xff]   ;;  %v720_v9 = vmov 0   ;;  %vm345_vm1 = vcmask 261120   ;;  %v395_v14 = vlaneseq }
  0x29   : > { %381 = vmatprep.mubr.bf16.mxu0 %v720_v9  ;;  %656 = vset.pattern.permute.xlu0 %v720_v9  ;;  %v660_v10 = vld [vmem:[%s257_s11 + $0x14] ss:$8 sps:$4 sm:$0xff]   ;;  %v662_v11 = vld [vmem:[%s257_s11 + $0x10] ss:$8 sps:$4 sm:$0xff]   ;;  %v391_v31 = vld [vmem:[%s303_s10] sm:$0x3] }
  0x2a   : > { %349 = vmatprep.subr.bf16.mxu0 %v657_v7  ;;  %v390_v12 = vld [vmem:[%s833_s2] sm:$0xff]  ;;  %v396_v20 = vshrl.u32 %v395_v14, 7  ;;  %v408_v26 = vand.u32 127, %v395_v14  ;;  %s604_s24 = sshll.u32 %s709_s17, 8  ;;  %v443_v47 = vld [vmem:[#allocation4] sm:$0xff]  ;;  %p609_p11 = scmp.ne.s32.totalorder %s709_s17, 3 }
  0x2b   : > { %350 = vmatpush1.bf16.msra.mxu0 %v659_v8  ;;  %393 = vperm.xlu0 %656, %v390_v12   ;;  %v415_v41 = vstv %s604_s24  ;;  %v442_v45 = vld [vmem:[#allocation3] sm:$0xff]  ;;  %vm481_vm8 = vcmask (!%p609_p11), 7168  }
  0x2c   : > { %351 = vmatprep.subr.bf16.mxu0 %v660_v10  ;;  %v324_v13 = vld [vmem:[#allocation2] sm:$0xf]  ;;  %v397_v32 = vsub.s32 0, %v396_v20  ;;  %v401_v37 = vsub.s32 1, %v396_v20  ;;  %v409_v38 = vadd.s32 128, %v408_v26  ;;  %v410_v40 = vsub.s32 %v396_v20, %v408_v26 }
  0x2e   : > { %v398_v39 = vrot.slane %v391_v31, %v397_v32  ;;  %v402_v43 = vrot.slane %v391_v31, %v401_v37  ;;  %v411_v44 = vsub.s32 %v396_v20, %v409_v38  ;;  %vm416_vm2 = vcmp.ne.s32.totalorder %v410_v40, %v415_v41 }
  0x2f   : > { %352 = vmatpush1.bf16.msra.mxu0 %v662_v11 }
  0x30   : > { %vm417_vm4 = vcmp.ne.s32.totalorder %v411_v44, %v415_v41 }
  0x32   : > { %603 = vmatmul.mubr.msk.bf16.vlgmr.msra.gmra.mrb[0].mxu0 %vm345_vm1, %v324_v13 }
  0xaa   : > { %v394_v42 = vpop.permute.xlu0 %393 }
  0xab   : > { %vm403_vm3 = vcmp.eq.s32.totalorder %v394_v42, %v398_v39  ;;  %vm404_vm5 = vcmp.eq.s32.totalorder %v394_v42, %v402_v43 }
  0xac   : > { %vm420_vm6 = vmand %vm403_vm3, %vm416_vm2 }
  0xad   : > { %vm421_vm7 = vmand %vm404_vm5, %vm417_vm4 }
 0x105   : > { %v383_v15 = vpop.f32.mrb[0].mxu0 }
 0x106   : > { %v418_v16 = vmul.f32 32.0, %v383_v15  ;;  %v385_v17 = vpop.f32.mrb[1].mxu0 }
 0x107   : > { %v419_v18 = vmul.f32 32.0, %v385_v17  ;;  %v387_v19 = vpop.f32.mrb[2].mxu0 }
 0x108   : > { %v422_v21 = vsub.f32 0.0, %v418_v16  ;;  %v432_v22 = vadd.f32 8.0, %v418_v16  ;;  %v388_v23 = vpop.f32.mrb[3].mxu0 }
 0x109   : > { %v423_v24 = vsub.f32 0.0, %v419_v18  ;;  %v433_v25 = vadd.f32 8.0, %v419_v18 }
 0x10a   : > { %v605_v27 = vadd.f32 -32.0, %v422_v21  ;;  %v607_v28 = vadd.f32 -40.0, %v432_v22 }
 0x10b   : > { %v606_v29 = vadd.f32 -32.0, %v423_v24  ;;  %v608_v30 = vadd.f32 -40.0, %v433_v25 }
 0x10c   : > { %v426_v33 = vmul.f32 1.442695, %v605_v27  ;;  %v436_v34 = vmul.f32 1.442695, %v607_v28 }
 0x10d   : > { %v428_v35 = vmul.f32 1.442695, %v606_v29  ;;  %v438_v36 = vmul.f32 1.442695, %v608_v30 }
 0x10e   : > { %663 = vpow2.f32 %v426_v33 }
 0x10f   : > { %665 = vpow2.f32 %v436_v34 }
 0x110   : > { %667 = vpow2.f32 %v428_v35 }
 0x111   : > { %669 = vpow2.f32 %v438_v36 }
 0x118   : > { %v664_v46 = vpop.eup %663 }
 0x119   : > { %v666_v48 = vpop.eup %665  ;;  %v430_v49 = vsel %vm420_vm6, %v664_v46, 0.0  ;;  %453 = sbr.rel (%p609_p11) target bundleno = 490 (0x1ea), region = 82 }
 0x11a   : > { %v668_v50 = vpop.eup %667  ;;  %v440_v51 = vsel %vm403_vm3, 0.0, %v666_v48  ;;  %v444_v52 = vadd.f32 %v442_v45, %v430_v49 }
 0x11b   : > { %v670_v53 = vpop.eup %669  ;;  %v431_v54 = vsel %vm421_vm7, %v668_v50, 0.0  ;;  %v445_v55 = vadd.f32 %v443_v47, %v440_v51 }
 0x11c   : > { %v441_v56 = vsel %vm404_vm5, 0.0, %v670_v53  ;;  %v446_v57 = vadd.f32 %v444_v52, %v431_v54 }
 0x11d   : > { %v447_v58 = vadd.f32 %v445_v55, %v441_v56 }
 0x11e   : > { %448 = vst [vmem:[#allocation3] sm:$0xff] %v446_v57 }
 0x11f   : > { %449 = vst [vmem:[#allocation4] sm:$0xff] %v447_v58 }
 0x125   : > { %v454_v59 = vld [vmem:[#allocation3] sm:$0xff] }
 0x126   : > { %455 = vadd.xlane.f32.xlu0 %v454_v59  ;;  %v457_v60 = vld [vmem:[#allocation4] sm:$0xff] }
 0x12a   : > { %458 = vadd.xlane.f32.xlu0 %v457_v60 }
 0x1b3   : > { %v456_v61 = vpop.xlane.xlu0 %455 }
 0x1b4   : > { %671 = vlog2.f32 %v456_v61 }
 0x1b7   : > { %v459_v62 = vpop.xlane.xlu0 %458 }
 0x1b8   : > { %673 = vlog2.f32 %v459_v62 }
 0x1be   : > { %v672_v63 = vpop.eup %671 }
 0x1bf   : > { %v461_v0 = vmul.f32 0.6931472, %v672_v63 }
 0x1c1   : > { %v462_v3 = vadd.f32 32.0, %v461_v0 }
 0x1c2   : > { %v674_v1 = vpop.eup %673 }
 0x1c3   : > { %v464_v2 = vmul.f32 0.6931472, %v674_v1 }
 0x1c5   : > { %v465_v4 = vadd.f32 40.0, %v464_v2 }
 0x1c7   : > { %v466_v5 = vadd.f32 %v465_v4, %v462_v3 }
 0x1c9   : > { %v468_v6 = vmin.f32 %v466_v5, 20.0  ;;  %vm467_vm10 = vcmp.gt.f32.partialorder %v466_v5, 20.0 }
 0x1cb   : > { %v469_v7 = vmul.f32 1.442695, %v468_v6 }
 0x1cd   : > { %675 = vpow2.f32 %v469_v7 }
 0x1d7   : > { %v676_v8 = vpop.eup %675 }
 0x1d8   : > { %v471_v9 = vadd.f32 1.0, %v676_v8  ;;  %v474_v10 = vmul.f32 -0.5, %v676_v8  ;;  %v477_v12 = vand.u32 2147483647, %v676_v8 }
 0x1da   : > { %677 = vlog2.f32 %v471_v9  ;;  %v475_v11 = vadd.f32 1.0, %v474_v10  ;;  %vm478_vm9 = vcmp.lt.f32.partialorder %v477_v12, 0.0004427343 }
 0x1dc   : > { %v476_v15 = vmul.f32 %v676_v8, %v475_v11 }
 0x1e4   : > { %v678_v13 = vpop.eup %677 }
 0x1e5   : > { %v473_v14 = vmul.f32 0.6931472, %v678_v13 }
 0x1e7   : > { %v479_v16 = vsel %vm478_vm9, %v476_v15, %v473_v14 }
 0x1e8   : > { %v480_v17 = vsel %vm467_vm10, %v466_v5, %v479_v16 }
 0x1e9   : > { %482 = vst.msk [vmem:[%s835_s4] sm:$0xff] %vm481_vm8, %v480_v17 }
 0x1ea PF: > { %s14_s19 = sadd.s32 1, %s717_s19   ;;  %s836_s15 = smov %s705_s16 }
 0x1eb   : > { %p11_p12 = scmp.ge.s32.totalorder %s14_s19, 6   ;;  %s837_s16 = smov %s781_s23 }
 0x1ec   : > { %s838_s17 = smov %s713_s18  ;;  %s839_s18 = smov %s841_s20 }
 0x1ed   :  { %13 = sbr.rel (!%p11_p12) target bundleno = 3 (0x3), region = 126 }

</bundles_post_ra>
